<compile_context>
chip_gen: v5e
topology: v5e:2x2
jax: 0.10.0
libtpu: 0.0.40
codegen_flags: <defaults>
</compile_context>

<pallas_src>
import jax
import jax.numpy as jnp
from jax.experimental import pallas as pl
from jax.experimental.pallas import tpu as pltpu

NUM_CLASSES = 5
OUT_PER_CLASS = 2
OUT_DIM = NUM_CLASSES * OUT_PER_CLASS   # 10 real output columns
LANE = 128                              # padded lane width -> unmasked stores
TILE_B = 128                            # batch tile (multiple of 8)


# ----------------------------------------------------------------------------- kernel
def readout_kernel(xi_ref, xj_ref, wa_ref, wb_ref, b_ref, out_ref):
    # xi_ref : (tile_b, Di)    first half of the concatenated edge features
    # xj_ref : (tile_b, Dj)    second half
    # wa_ref : (Di, LANE)      folded effective weight rows for xi (zero-padded lanes)
    # wb_ref : (Dj, LANE)      folded effective weight rows for xj
    # b_ref  : (1, LANE)       folded effective bias (zero-padded lanes)
    # out_ref: (tile_b, LANE)  lane-dense output block (cols [0:10] are the logits)
    acc = jnp.dot(xi_ref[...], wa_ref[...], preferred_element_type=jnp.float32)
    acc = acc + jnp.dot(xj_ref[...], wb_ref[...], preferred_element_type=jnp.float32)
    out_ref[...] = (acc + b_ref[...]).astype(out_ref.dtype)


# ----------------------------------------------------------------------------- wrappers
def _round_up(x, m):
    return ((x + m - 1) // m) * m


def fold_params(params, d_i):
    """One-time prepare step: fold the 5 (fc1, fc2) pairs into a single padded
    effective weight split by input half, plus a padded effective bias."""
    w1t, b1, w2t, b2 = params               # (5,D,H), (5,H), (5,H,2), (5,2)
    D = w1t.shape[1]
    # W_eff: (D, 5, 2) -> (D, 10);  column index = k*2 + o
    w_eff = jnp.einsum("kdh,kho->dko", w1t, w2t).reshape(D, OUT_DIM)
    b_eff = (jnp.einsum("kh,kho->ko", b1, w2t) + b2).reshape(OUT_DIM)
    # pad output lanes 10 -> 128 so the kernel's store is unmasked / lane-dense
    w_pad = jnp.zeros((D, LANE), jnp.float32).at[:, :OUT_DIM].set(w_eff)
    b_pad = jnp.zeros((1, LANE), jnp.float32).at[0, :OUT_DIM].set(b_eff)
    return w_pad[:d_i], w_pad[d_i:], b_pad  # (Di,128), (Dj,128), (1,128)


def readout_forward_batched(edge_features_i, edge_features_j, folded):
    """Batched forward: (B, Di), (B, Dj) -> (B, 5, 2) logits."""
    wa, wb, b_row = folded
    B, Di = edge_features_i.shape
    Dj = edge_features_j.shape[1]

    bp = _round_up(max(B, 1), 8)
    tile = min(TILE_B, bp)
    bp = _round_up(bp, tile)
    if bp != B:
        pad = ((0, bp - B), (0, 0))
        xi = jnp.pad(edge_features_i.astype(jnp.float32), pad)
        xj = jnp.pad(edge_features_j.astype(jnp.float32), pad)
    else:
        xi = edge_features_i.astype(jnp.float32)
        xj = edge_features_j.astype(jnp.float32)

    out = pl.pallas_call(
        readout_kernel,
        out_shape=jax.ShapeDtypeStruct((bp, LANE), jnp.float32),
        grid=(bp // tile,),
        in_specs=[
            pl.BlockSpec((tile, Di), lambda i: (i, 0)),     # xi: tiled over batch
            pl.BlockSpec((tile, Dj), lambda i: (i, 0)),     # xj: tiled over batch
            pl.BlockSpec((Di, LANE), lambda i: (0, 0)),     # weights: VMEM-resident
            pl.BlockSpec((Dj, LANE), lambda i: (0, 0)),     # (constant block index ->
            pl.BlockSpec((1, LANE), lambda i: (0, 0)),      #  DMA'd once, not per tile)
        ],
        out_specs=pl.BlockSpec((tile, LANE), lambda i: (i, 0)),
        compiler_params=pltpu.CompilerParams(
            dimension_semantics=("parallel",),              # megacore on v7x
        ),
    )(xi, xj, wa, wb, b_row)

    logits = out[:B, :OUT_DIM].reshape(B, NUM_CLASSES, OUT_PER_CLASS)
    return logits


def readout_forward(edge_features_i, edge_features_j, folded):
    """Single-edge forward matching the PyTorch module: (1, Di),(1, Dj) -> (5, 2)."""
    return readout_forward_batched(edge_features_i, edge_features_j, folded)[0]


# ----------------------------------------------------------------------------- params / reference
def init_params(key, input_size, hidden_size):
    """Deterministic synthetic init (PyTorch-Linear-style uniform bounds).
    Stored stacked & pre-transposed: weights are (5, in_features, out_features)."""
    k1, k2, k3, k4 = jax.random.split(key, 4)
    bound1 = 1.0 / jnp.sqrt(input_size)
    bound2 = 1.0 / jnp.sqrt(hidden_size)
    w1t = jax.random.uniform(k1, (NUM_CLASSES, input_size, hidden_size),
                             jnp.float32, -bound1, bound1)
    b1 = jax.random.uniform(k2, (NUM_CLASSES, hidden_size),
                            jnp.float32, -bound1, bound1)
    w2t = jax.random.uniform(k3, (NUM_CLASSES, hidden_size, OUT_PER_CLASS),
                             jnp.float32, -bound2, bound2)
    b2 = jax.random.uniform(k4, (NUM_CLASSES, OUT_PER_CLASS),
                            jnp.float32, -bound2, bound2)
    return w1t, b1, w2t, b2


def reference_forward_batched(edge_features_i, edge_features_j, params):
    """Pure-JAX reference mirroring the PyTorch module exactly (unfused)."""
    w1t, b1, w2t, b2 = params
    x = jnp.concatenate([edge_features_i, edge_features_j], axis=1)
    outs = []
    for k in range(NUM_CLASSES):
        h = x @ w1t[k] + b1[k]
        o = h @ w2t[k] + b2[k]
        outs.append(o)
    return jnp.stack(outs, axis=1)          # (B, 5, 2)


def reference_forward(edge_features_i, edge_features_j, params):
    return reference_forward_batched(edge_features_i, edge_features_j, params)[0]


# ----------------------------------------------------------------------------- main
if __name__ == "__main__":
    # shapes consistent with the module: readout_input_size = 32, hidden_size = 32,
    # each edge feature vector is half of the concatenated input (16).
    input_size = 32
    hidden_size = 32
    d_half = input_size // 2

    key = jax.random.PRNGKey(0)
    kp, ki, kj, kbi, kbj = jax.random.split(key, 5)

    params = init_params(kp, input_size, hidden_size)
    folded = fold_params(params, d_half)     # one-time prepare step

    # --- single-edge path (module semantics): (1,16),(1,16) -> (5,2)
    xi1 = jax.random.normal(ki, (1, d_half), jnp.float32)
    xj1 = jax.random.normal(kj, (1, d_half), jnp.float32)
    logits = jax.block_until_ready(readout_forward(xi1, xj1, folded))
    ref = reference_forward(xi1, xj1, params)
    assert logits.shape == (NUM_CLASSES, OUT_PER_CLASS)
    assert logits.dtype == jnp.float32
    assert jnp.allclose(logits, ref, atol=1e-4, rtol=1e-4)

    # --- batched path (amortizes launch/DMA, feeds the MXU, exercises grid + padding)
    B = 200                                   # non-multiple of the 128 tile on purpose
    xib = jax.random.normal(kbi, (B, d_half), jnp.float32)
    xjb = jax.random.normal(kbj, (B, d_half), jnp.float32)
    out_b = jax.block_until_ready(readout_forward_batched(xib, xjb, folded))
    ref_b = reference_forward_batched(xib, xjb, params)
    assert out_b.shape == (B, NUM_CLASSES, OUT_PER_CLASS)
    assert jnp.allclose(out_b, ref_b, atol=1e-4, rtol=1e-4)

    print("KERNEL_OK")
</pallas_src>

<mosaic_0001>
module attributes {stable_mosaic.version = 11 : i64} {
  func.func @readout_kernel(%arg0: i32, %arg1: memref<8x16xf32, #tpu.memory_space<vmem>>, %arg2: memref<8x16xf32, #tpu.memory_space<vmem>>, %arg3: memref<16x128xf32, #tpu.memory_space<vmem>>, %arg4: memref<16x128xf32, #tpu.memory_space<vmem>>, %arg5: memref<1x128xf32, #tpu.memory_space<vmem>>, %arg6: memref<8x128xf32, #tpu.memory_space<vmem>>) attributes {dimension_semantics = [#tpu.dimension_semantics<parallel>], iteration_bounds = array<i64: 1>, scalar_prefetch = 0 : i64, scratch_operands = 0 : i64, tpu.core_type = #tpu.core_type<tc>, window_params = [{transform_indices = @transform_0, window_bounds = array<i64: 8, 16>}, {transform_indices = @transform_1, window_bounds = array<i64: 8, 16>}, {pipeline_mode = #tpu.pipeline_mode<synchronous>, transform_indices = @transform_2, window_bounds = array<i64: 16, 128>}, {pipeline_mode = #tpu.pipeline_mode<synchronous>, transform_indices = @transform_3, window_bounds = array<i64: 16, 128>}, {pipeline_mode = #tpu.pipeline_mode<synchronous>, transform_indices = @transform_4, window_bounds = array<i64: 1, 128>}, {transform_indices = @transform_5, window_bounds = array<i64: 8, 128>}]} {
    %c0 = arith.constant 0 : index
    %c0_0 = arith.constant 0 : index
    %0 = vector.load %arg1[%c0, %c0_0] : memref<8x16xf32, #tpu.memory_space<vmem>>, vector<8x16xf32>
    %c0_1 = arith.constant 0 : index
    %c0_2 = arith.constant 0 : index
    %1 = vector.load %arg3[%c0_1, %c0_2] : memref<16x128xf32, #tpu.memory_space<vmem>>, vector<16x128xf32>
    %cst = arith.constant dense<0.000000e+00> : vector<8x128xf32>
    %2 = tpu.matmul %0, %1, %cst {dimension_numbers = #tpu.dot_dimension_numbers<[1], [0], [0], [1], [0, 0, 1, 1], [], []>} : vector<8x16xf32>, vector<16x128xf32>, vector<8x128xf32> -> vector<8x128xf32>
    %c0_3 = arith.constant 0 : index
    %c0_4 = arith.constant 0 : index
    %3 = vector.load %arg2[%c0_3, %c0_4] : memref<8x16xf32, #tpu.memory_space<vmem>>, vector<8x16xf32>
    %c0_5 = arith.constant 0 : index
    %c0_6 = arith.constant 0 : index
    %4 = vector.load %arg4[%c0_5, %c0_6] : memref<16x128xf32, #tpu.memory_space<vmem>>, vector<16x128xf32>
    %cst_7 = arith.constant dense<0.000000e+00> : vector<8x128xf32>
    %5 = tpu.matmul %3, %4, %cst_7 {dimension_numbers = #tpu.dot_dimension_numbers<[1], [0], [0], [1], [0, 0, 1, 1], [], []>} : vector<8x16xf32>, vector<16x128xf32>, vector<8x128xf32> -> vector<8x128xf32>
    %6 = arith.addf %2, %5 : vector<8x128xf32>
    %c0_8 = arith.constant 0 : index
    %c0_9 = arith.constant 0 : index
    %7 = vector.load %arg5[%c0_8, %c0_9] : memref<1x128xf32, #tpu.memory_space<vmem>>, vector<1x128xf32>
    %8 = vector.broadcast %7 : vector<1x128xf32> to vector<8x128xf32>
    %9 = arith.addf %6, %8 : vector<8x128xf32>
    %c0_10 = arith.constant 0 : index
    %c0_11 = arith.constant 0 : index
    %10 = vector.load %arg6[%c0_10, %c0_11] : memref<8x128xf32, #tpu.memory_space<vmem>>, vector<8x128xf32>
    tpu.vector_store %arg6[%c0_10, %c0_11], %9 {strides = array<i32>} : memref<8x128xf32, #tpu.memory_space<vmem>>, vector<8x128xf32>,
    return
  }
  func.func @transform_0(%arg0: i32) -> (i32, i32) {
    %c0_i32 = arith.constant 0 : i32
    %c0_i32_0 = arith.constant 0 : i32
    return %arg0, %c0_i32 : i32, i32
  }
  func.func @transform_1(%arg0: i32) -> (i32, i32) {
    %c0_i32 = arith.constant 0 : i32
    %c0_i32_0 = arith.constant 0 : i32
    return %arg0, %c0_i32 : i32, i32
  }
  func.func @transform_2(%arg0: i32) -> (i32, i32) {
    %c0_i32 = arith.constant 0 : i32
    %c0_i32_0 = arith.constant 0 : i32
    %c0_i32_1 = arith.constant 0 : i32
    return %c0_i32, %c0_i32_0 : i32, i32
  }
  func.func @transform_3(%arg0: i32) -> (i32, i32) {
    %c0_i32 = arith.constant 0 : i32
    %c0_i32_0 = arith.constant 0 : i32
    %c0_i32_1 = arith.constant 0 : i32
    return %c0_i32, %c0_i32_0 : i32, i32
  }
  func.func @transform_4(%arg0: i32) -> (i32, i32) {
    %c0_i32 = arith.constant 0 : i32
    %c0_i32_0 = arith.constant 0 : i32
    %c0_i32_1 = arith.constant 0 : i32
    return %c0_i32, %c0_i32_0 : i32, i32
  }
  func.func @transform_5(%arg0: i32) -> (i32, i32) {
    %c0_i32 = arith.constant 0 : i32
    %c0_i32_0 = arith.constant 0 : i32
    return %arg0, %c0_i32 : i32, i32
  }
}

</mosaic_0001>

<bundles_post_ra>
// kernel: tpu_custom_call.1
= control target key start
LH: loop header
LB: loop body
LE: loop exit
PB: predicated region body
PF: predicated region fallthrough
CT: control target
= control target key end

     0   :  { %10 = vsyncpa [#allocation3], 0  ;;  %s351_s0 = inlined_call_operand.hbm [shape: f32[8,16], index: 0, kind: input, shape index: {}]   ;;  %s352_s1 = inlined_call_operand.hbm [shape: f32[8,16], index: 1, kind: input, shape index: {}]   ;;  %s353_s2 = inlined_call_operand.hbm [shape: f32[16,128], index: 2, kind: input, shape index: {}]   ;;  %s354_s3 = inlined_call_operand.hbm [shape: f32[16,128], index: 3, kind: input, shape index: {}]   ;;  %s355_s4 = inlined_call_operand.vmem [shape: f32[1,128], index: 4, kind: input, shape index: {}]   ;;  %s356_s5 = inlined_call_operand.hbm [shape: f32[8,128], index: 5, kind: output, shape index: {}]  }
   0x1   :  { %11 = vsyncpa [#allocation6], 0 }
   0x2   :  { %12 = vsyncpa [#allocation9], 0  ;;  %s30_s20 = sshll.u32 %s352_s1, 4  ;;  %s31_s20 = int_to_ptr.hbm [resolvable:$true] %s30_s20 }
   0x3   :  { %13 = vsyncpa [#allocation4], 0  ;;  %s296_s21 = smov [#allocation5]   ;;  %s19_s25 = sshll.u32 %s351_s0, 4  ;;  %s20_s25 = int_to_ptr.hbm [resolvable:$true] %s19_s25 }
   0x4   :  { %s32_s22 = sshll.u32 %s296_s21, 4  ;;  %s297_s26 = smov [#allocation2]   ;;  %s33_s22 = int_to_ptr.vmem [resolvable:$true] %s32_s22 }
   0x5   :  { %35 = dma.hbm_to_vmem [thread:$0]  %s31_s20, 128, %s33_s22, [#allocation6]  }
   0x6   :  { %s21_s27 = sshll.u32 %s297_s26, 4  ;;  %s40_s30 = sshll.u32 %s353_s2, 4  ;;  %s22_s27 = int_to_ptr.vmem [resolvable:$true] %s21_s27  ;;  %s41_s30 = int_to_ptr.hbm [resolvable:$true] %s40_s30 }
   0x7   :  { %24 = dma.hbm_to_vmem [thread:$0]  %s20_s25, 128, %s22_s27, [#allocation3]  }
   0x8   :  { %s298_s1 = smov [#allocation7]   ;;  %s53_s9 = sshll.u32 %s354_s3, 4  ;;  %s54_s9 = int_to_ptr.hbm [resolvable:$true] %s53_s9 }
   0x9   :  { %s42_s6 = sshll.u32 %s298_s1, 4  ;;  %s299_s10 = smov 128   ;;  %s43_s6 = int_to_ptr.vmem [resolvable:$true] %s42_s6 }
   0xa   :  { %s300_s0 = smov 8   ;;  %s301_s11 = smov [#allocation8]  }
   0xb   :  { %48 = dma.hbm_to_vmem [thread:$0]  %s41_s30, 256, %s43_s6, [#allocation6], %s299_s10, %s299_s10, %s300_s0  }
   0xc   :  { %s55_s12 = sshll.u32 %s301_s11, 4  ;;  %s56_s12 = int_to_ptr.vmem [resolvable:$true] %s55_s12 }
   0xd   :  { %61 = dma.hbm_to_vmem [thread:$0]  %s54_s9, 256, %s56_s12, [#allocation9], %s299_s10, %s299_s10, %s300_s0  }
   0xe   :  { %288 = dma.done.wait [#allocation3], 128  }
   0xf   :  { %289 = vsyncadd [#allocation3], 4294967168 }
  0x10   :  { %290 = dma.done.wait [#allocation6], 384  }
  0x11   :  { %291 = vsyncadd [#allocation6], 4294966912 }
  0x12   :  { %292 = dma.done.wait [#allocation9], 256  }
  0x13   :  { %293 = vsyncadd [#allocation9], 4294967040  ;;  %v85_v0 = vld [vmem:[#allocation8 + $0x8] sm:$0xff]  ;;  %v82_v1 = vld [vmem:[#allocation7 + $0x8] sm:$0xff]  ;;  %vm86_vm0 = vcmask 130048   ;;  %s302_s13 = smov [#allocation10]  }
  0x14   :  { %v84_v2 = vld [vmem:[#allocation8] sm:$0xff]  ;;  %104 = vmatpush.msra.mxu0 %v85_v0  ;;  %127 = vmatpush.msra.mxu1 %v82_v1  ;;  %v81_v3 = vld [vmem:[#allocation7] sm:$0xff]  ;;  %v83_v4 = vld [vmem:[#allocation5] sm:$0xff]  ;;  %s144_s14 = sshll.u32 %s302_s13, 4  ;;  %s146_s17 = sshll.u32 %s356_s5, 4  ;;  %s145_s14 = int_to_ptr.vmem [resolvable:$true] %s144_s14  ;;  %s147_s17 = int_to_ptr.hbm [resolvable:$true] %s146_s17 }
  0x15   :  { %v80_v5 = vld [vmem:[#allocation2] sm:$0xff] }
  0x16   :  { %105 = vmatpush.msra.mxu0 %v84_v2  ;;  %128 = vmatpush.msra.mxu1 %v81_v3  ;;  %v167_v6 = vld [vmem:[%s355_s4] ss:$0 sm:$0xff] }
  0x17   :  { %158 = vmatmul.msk.f32.vlgmr.msra.gmra.mxu0 %vm86_vm0, %v83_v4  ;;  %159 = vmatmul.msk.f32.vlgmr.msra.gmra.mxu1 %vm86_vm0, %v80_v5 }
  0x94   :  { %v107_v7 = vpop.f32.mrf.mxu0  ;;  %v130_v8 = vpop.f32.mrf.mxu1 }
  0x95   :  { %v131_v9 = vadd.f32 %v130_v8, %v107_v7 }
  0x97   :  { %v137_v10 = vadd.f32 %v167_v6, %v131_v9 }
  0x99   :  { %138 = vst [vmem:[#allocation10] sm:$0xff] %v137_v10 }
  0x9a   :  { %149 = dma.vmem_to_hbm [thread:$0]  %s145_s14, 128, %s147_s17, [#allocation4]  }
  0x9b   :  { %294 = dma.done.wait [#allocation4], 128  }
  0x9c   :  { %295 = vsyncadd [#allocation4], 4294967168 }
  0x9d   :  { %154 = vsyncpa [#allocation3], 1 }
  0x9e   :  { %155 = vsyncpa [#allocation6], 1 }
  0x9f   :  { %156 = vsyncpa [#allocation9], 1 }
  0xa0   :  { %157 = vsyncpa [#allocation4], 1 }

</bundles_post_ra>
